<compile_context>
chip_gen: v7x
topology: tpu7x:2x2x1
jax: 0.10.0
libtpu: 0.0.40
codegen_flags: <defaults>
</compile_context>

<pallas_src>
import functools

import jax
import jax.numpy as jnp
from jax.experimental import pallas as pl
from jax.experimental.pallas import tpu as pltpu


def _round_up(x: int, m: int) -> int:
    return ((x + m - 1) // m) * m


def _pick_tile(dim_pad: int, cap: int) -> int:
    """Largest tile in {512,384,256,128} that divides dim_pad and is <= cap."""
    for t in (512, 384, 256, 128):
        if t <= cap and dim_pad % t == 0:
            return t
    return 128  # dim_pad is always a multiple of 128


def _support_kernel(feat_ref, wt_ref, out_ref, *, active: bool):
    """support tile = [tanh](feat_tile @ w_t); bf16 MXU operands, f32 math."""
    s = jnp.dot(feat_ref[...].astype(jnp.bfloat16), wt_ref[...],
                preferred_element_type=jnp.float32)
    if active:
        s = jnp.tanh(s)
    out_ref[...] = s.astype(out_ref.dtype)


def _aggregate_kernel(adj_ref, sup_ref, out_ref, *, tk: int, resident: bool):
    """out tile (i, j) += adj tile (i, k) @ support chunk (k, j).

    Accumulates directly into out_ref (f32, VMEM-resident across k).
    adj arrives as f32 and is cast to bf16 just before the MXU dot, so the
    wrapper never touches the (N, N) array.
    """
    k = pl.program_id(2)

    @pl.when(k == 0)
    def _():
        out_ref[...] = jnp.zeros_like(out_ref)

    adj_t = adj_ref[...].astype(jnp.bfloat16)
    if resident:
        start = pl.multiple_of(k * tk, tk)
        sup_t = sup_ref[pl.ds(start, tk), :]
    else:
        sup_t = sup_ref[...]

    out_ref[...] += jnp.dot(adj_t, sup_t, preferred_element_type=jnp.float32)


def gnn_layer(features, adj, w, *, active=False):
    """Pallas implementation of GNNLayer.forward (non-'acm' path).

    features: (N, in_f) f32   adj: (N, N) f32   w: (out_f, in_f) f32
    returns:  (N, out_f) f32
    """
    n, in_f = features.shape
    out_f, in_f2 = w.shape
    assert in_f == in_f2
    assert adj.shape == (n, n)

    # --- pad only to lane/sublane granularity (128); zero pad is matmul-neutral
    n_pad = _round_up(n, 128)
    in_pad = _round_up(in_f, 128)
    out_pad = _round_up(out_f, 128)

    feat_p = features.astype(jnp.float32)
    if (n_pad, in_pad) != (n, in_f):
        feat_p = jnp.pad(feat_p, ((0, n_pad - n), (0, in_pad - in_f)))

    wt_p = w.T.astype(jnp.bfloat16)                    # transpose tiny weight in wrapper
    if (in_pad, out_pad) != (in_f, out_f):
        wt_p = jnp.pad(wt_p, ((0, in_pad - in_f), (0, out_pad - out_f)))

    adj_p = adj.astype(jnp.float32)                    # no wrapper cast pass
    if n_pad != n:
        adj_p = jnp.pad(adj_p, ((0, n_pad - n), (0, n_pad - n)))

    # ---------------- pass 1: support = [tanh](features @ w.T) ----------------
    # Cheap pass (<1% of flops): use a large row tile to amortize grid-step cost.
    tm1 = 128
    for t in (1024, 512, 384, 256, 128):
        if n_pad % t == 0:
            blk_bytes = 2 * (t * in_pad * 4 + in_pad * out_pad * 2 + t * out_pad * 2)
            if blk_bytes <= 12 * 1024 * 1024:
                tm1 = t
                break
    # TODO(synk): if in_pad*out_pad ever exceeds VMEM, pass 1 would need k-tiling.

    support = pl.pallas_call(
        functools.partial(_support_kernel, active=active),
        out_shape=jax.ShapeDtypeStruct((n_pad, out_pad), jnp.bfloat16),
        grid_spec=pltpu.PrefetchScalarGridSpec(
            num_scalar_prefetch=0,
            grid=(n_pad // tm1,),
            in_specs=[
                pl.BlockSpec((tm1, in_pad), lambda i: (i, 0)),       # feature rows (f32)
                pl.BlockSpec((in_pad, out_pad), lambda i: (0, 0)),   # w.T (small, resident)
            ],
            out_specs=pl.BlockSpec((tm1, out_pad), lambda i: (i, 0)),
        ),
        compiler_params=pltpu.CompilerParams(
            dimension_semantics=("parallel",),
            vmem_limit_bytes=32 * 1024 * 1024),
    )(feat_p, wt_p)

    # ---------------------- pass 2: output = adj @ support --------------------
    # Keep >= 2 row blocks when possible so the parallel i axis spans both
    # TensorCores on v7x; tiles are divisors of the 128-padded dims.
    tm = _pick_tile(n_pad, min(512, max(128, n_pad // 2)))
    tk = _pick_tile(n_pad, 512)

    budget = 20 * 1024 * 1024  # conservative: fits default scoped VMEM everywhere

    def _vmem_est(tn, resident):
        adj_b = 2 * tm * tk * 4                                   # f32 adj blocks
        sup_b = 2 * (n_pad * out_pad if resident else tk * tn) * 2  # bf16 support
        out_b = 2 * tm * tn * 4                                   # f32 output block
        return adj_b + sup_b + out_b

    resident = False
    if _vmem_est(out_pad, True) <= budget:
        tn, resident = out_pad, True        # support DMA'd once, adj streamed once
    elif _vmem_est(out_pad, False) <= budget:
        tn = out_pad                        # adj streamed once, support re-read per i
    else:
        tn = _pick_tile(out_pad, 512)       # fall back to fully tiled

    grid = (n_pad // tm, out_pad // tn, n_pad // tk)
    i_blocks, j_blocks = grid[0], grid[1]

    if resident:
        sup_spec = pl.BlockSpec((n_pad, tn), lambda i, j, k: (0, j))
    else:
        sup_spec = pl.BlockSpec((tk, tn), lambda i, j, k: (k, j))

    out_padded = pl.pallas_call(
        functools.partial(_aggregate_kernel, tk=tk, resident=resident),
        out_shape=jax.ShapeDtypeStruct((n_pad, out_pad), jnp.float32),
        grid_spec=pltpu.PrefetchScalarGridSpec(
            num_scalar_prefetch=0,
            grid=grid,
            in_specs=[
                pl.BlockSpec((tm, tk), lambda i, j, k: (i, k)),   # adj tile (f32)
                sup_spec,                                         # support (bf16)
            ],
            out_specs=pl.BlockSpec((tm, tn), lambda i, j, k: (i, j)),
        ),
        compiler_params=pltpu.CompilerParams(
            dimension_semantics=("parallel", "parallel", "arbitrary"),
            vmem_limit_bytes=32 * 1024 * 1024),
        cost_estimate=pl.CostEstimate(
            flops=2 * n_pad * n_pad * out_pad,
            transcendentals=0,
            bytes_accessed=(4 * n_pad * n_pad * j_blocks                       # adj (f32)
                            + 2 * n_pad * out_pad * (1 if resident else i_blocks)  # support
                            + 4 * n_pad * out_pad)),                           # output (f32)
    )(adj_p, support)

    return out_padded[:n, :out_f]


def _xavier_uniform(key, shape, dtype=jnp.float32):
    fan_out, fan_in = shape
    limit = (6.0 / (fan_in + fan_out)) ** 0.5
    return jax.random.uniform(key, shape, dtype, minval=-limit, maxval=limit)


if __name__ == "__main__":
    N = 512            # graph nodes (multi-step grid, 2 row blocks for megacore)
    IN_FEATURES = 64
    OUT_FEATURES = 128

    key = jax.random.PRNGKey(0)
    k_feat, k_adj, k_w = jax.random.split(key, 3)

    features = jax.random.normal(k_feat, (N, IN_FEATURES), dtype=jnp.float32)
    adj = jax.random.uniform(k_adj, (N, N), dtype=jnp.float32) / N
    w = _xavier_uniform(k_w, (OUT_FEATURES, IN_FEATURES))

    out = jax.block_until_ready(gnn_layer(features, adj, w, active=True))

    # Reference following the same compute path (bf16 MXU operands, f32
    # accumulate, f32 tanh, bf16-stored support) so tolerances are tight.
    sup_ref = jnp.tanh(jnp.dot(features.astype(jnp.bfloat16),
                               w.T.astype(jnp.bfloat16),
                               preferred_element_type=jnp.float32)).astype(jnp.bfloat16)
    ref = jnp.dot(adj.astype(jnp.bfloat16), sup_ref,
                  preferred_element_type=jnp.float32)

    assert out.shape == (N, OUT_FEATURES)
    max_err = float(jnp.max(jnp.abs(out - ref)))
    assert jnp.allclose(out, ref, atol=2e-2, rtol=2e-2), max_err

    print("KERNEL_OK")
</pallas_src>

<mosaic_0001>
module attributes {stable_mosaic.version = 11 : i64} {
  func.func @_support_kernel(%arg0: i32, %arg1: memref<512x128xf32, #tpu.memory_space<vmem>>, %arg2: memref<128x128xbf16, #tpu.memory_space<vmem>>, %arg3: memref<512x128xbf16, #tpu.memory_space<vmem>>) attributes {dimension_semantics = [#tpu.dimension_semantics<parallel>], iteration_bounds = array<i64: 1>, scalar_prefetch = 0 : i64, scratch_operands = 0 : i64, tpu.core_type = #tpu.core_type<tc>, window_params = [{transform_indices = @transform_0, window_bounds = array<i64: 512, 128>}, {pipeline_mode = #tpu.pipeline_mode<synchronous>, transform_indices = @transform_1, window_bounds = array<i64: 128, 128>}, {transform_indices = @transform_2, window_bounds = array<i64: 512, 128>}]} {
    %c0 = arith.constant 0 : index
    %c0_0 = arith.constant 0 : index
    %0 = vector.load %arg1[%c0, %c0_0] : memref<512x128xf32, #tpu.memory_space<vmem>>, vector<512x128xf32>
    %1 = arith.truncf %0 : vector<512x128xf32> to vector<512x128xbf16>
    %c0_1 = arith.constant 0 : index
    %c0_2 = arith.constant 0 : index
    %2 = vector.load %arg2[%c0_1, %c0_2] : memref<128x128xbf16, #tpu.memory_space<vmem>>, vector<128x128xbf16>
    %cst = arith.constant dense<0.000000e+00> : vector<512x128xf32>
    %3 = tpu.matmul %1, %2, %cst {dimension_numbers = #tpu.dot_dimension_numbers<[1], [0], [0], [1], [0, 0, 1, 1], [], []>} : vector<512x128xbf16>, vector<128x128xbf16>, vector<512x128xf32> -> vector<512x128xf32>
    %4 = math.tanh %3 : vector<512x128xf32>
    %5 = arith.truncf %4 : vector<512x128xf32> to vector<512x128xbf16>
    %c0_3 = arith.constant 0 : index
    %c0_4 = arith.constant 0 : index
    %6 = vector.load %arg3[%c0_3, %c0_4] : memref<512x128xbf16, #tpu.memory_space<vmem>>, vector<512x128xbf16>
    tpu.vector_store %arg3[%c0_3, %c0_4], %5 {strides = array<i32>} : memref<512x128xbf16, #tpu.memory_space<vmem>>, vector<512x128xbf16>,
    return
  }
  func.func @transform_0(%arg0: i32) -> (i32, i32) {
    %c0_i32 = arith.constant 0 : i32
    %c0_i32_0 = arith.constant 0 : i32
    return %arg0, %c0_i32 : i32, i32
  }
  func.func @transform_1(%arg0: i32) -> (i32, i32) {
    %c0_i32 = arith.constant 0 : i32
    %c0_i32_0 = arith.constant 0 : i32
    %c0_i32_1 = arith.constant 0 : i32
    return %c0_i32, %c0_i32_0 : i32, i32
  }
  func.func @transform_2(%arg0: i32) -> (i32, i32) {
    %c0_i32 = arith.constant 0 : i32
    %c0_i32_0 = arith.constant 0 : i32
    return %arg0, %c0_i32 : i32, i32
  }
}

</mosaic_0001>

<bundles_post_ra>
// kernel: tpu_custom_call.1
= control target key start
LH: loop header
LB: loop body
LE: loop exit
PB: predicated region body
PF: predicated region fallthrough
CT: control target
= control target key end

     0   :  { %7 = vsyncpa [#allocation3], 0  ;;  %s1634_s0 = inlined_call_operand.hbm [shape: f32[512,128], index: 0, kind: input, shape index: {}]   ;;  %s1635_s1 = inlined_call_operand.hbm [shape: bf16[128,128], index: 1, kind: input, shape index: {}]   ;;  %s1636_s2 = inlined_call_operand.hbm [shape: bf16[512,128], index: 2, kind: output, shape index: {}]  }
   0x1   :  { %8 = vsyncpa [#allocation6], 0 }
   0x2   :  { %9 = vsyncpa [#allocation4], 0  ;;  %s1570_s9 = smov [#allocation2]   ;;  %s1498_s13 = scalar_lea.hbm %s1634_s0, 8192 }
   0x3   :  { %s15_s10 = sshll.u32 %s1570_s9, 4  ;;  %p1499_p0 = scmp.ne.s32.totalorder %s1634_s0, %s1498_s13  ;;  %s16_s10 = int_to_ptr.vmem [resolvable:$true] %s15_s10 }
   0x4   :  { %p1502_p1 = scmp.lt.u32.totalorder %s1498_s13, %s1634_s0 }
   0x6   :  { %p1504_p2 = pnand %p1502_p1, %p1499_p0 }
   0x8   :  { %1507 = shalt.err (!%p1504_p2)
}
   0x9   :  { %s1508_s18 = scalar_lea.vmem %s16_s10, 8192  ;;  %p1513_p4 = scmp.lt.s32.totalorder %s16_s10, %s16_s10 }
   0xa   :  { %p1509_p3 = scmp.ne.s32.totalorder %s16_s10, %s1508_s18  ;;  %p1514_p5 = scmp.lt.s32.totalorder %s1508_s18, %s1508_s18 }
   0xc   :  { %p1515_p6 = por %p1514_p5, %p1513_p4 }
   0xe   :  { %p1516_p7 = pnand %p1515_p6, %p1509_p3 }
  0x10   :  { %1519 = shalt.err (!%p1516_p7)
}
  0x11   :  { %s1571_s19 = smov 128   ;;  %s1572_s20 = smov 8  }
  0x12   :  { %21 = dma.hbm_to_vmem [thread:$0]  %s1634_s0, 8192, %s16_s10, [#allocation3], %s1571_s19, %s1571_s19, %s1572_s20  }
  0x13   :  { %s1573_s23 = smov [#allocation5]   ;;  %s1520_s27 = scalar_lea.hbm %s1635_s1, 1024 }
  0x14   :  { %s27_s24 = sshll.u32 %s1573_s23, 4  ;;  %p1521_p8 = scmp.ne.s32.totalorder %s1635_s1, %s1520_s27  ;;  %s28_s24 = int_to_ptr.vmem [resolvable:$true] %s27_s24 }
  0x15   :  { %p1524_p9 = scmp.lt.u32.totalorder %s1520_s27, %s1635_s1 }
  0x17   :  { %p1526_p10 = pnand %p1524_p9, %p1521_p8 }
  0x19   :  { %1529 = shalt.err (!%p1526_p10)
}
  0x1a   :  { %s1530_s4 = scalar_lea.vmem %s28_s24, 1024  ;;  %p1535_p12 = scmp.lt.s32.totalorder %s28_s24, %s28_s24 }
  0x1b   :  { %p1531_p11 = scmp.ne.s32.totalorder %s28_s24, %s1530_s4  ;;  %p1536_p13 = scmp.lt.s32.totalorder %s1530_s4, %s1530_s4 }
  0x1d   :  { %p1537_p0 = por %p1536_p13, %p1535_p12 }
  0x1f   :  { %p1538_p1 = pnand %p1537_p0, %p1531_p11 }
  0x21   :  { %1541 = shalt.err (!%p1538_p1)
}
  0x22   :  { %s1574_s0 = smov 64   ;;  %s1575_s5 = smov 4  }
  0x23   :  { %33 = dma.hbm_to_vmem [thread:$0]  %s1635_s1, 1024, %s28_s24, [#allocation6], %s1574_s0, %s1574_s0, %s1575_s5  }
  0x24   :  { %1564 = dma.done.wait [#allocation3], 8192  }
  0x25   :  { %1565 = vsyncadd [#allocation3], 4294959104 }
  0x26   :  { %1566 = dma.done.wait [#allocation6], 1024  }
  0x27   :  { %1567 = vsyncadd [#allocation6], 4294966272  ;;  %v1362_v0 = vld [vmem:[#allocation5] sm:$0xff]   ;;  %v1363_v1 = vld [vmem:[#allocation5 + $0x8] sm:$0xff]   ;;  %s1576_s1 = smov [#allocation7]  }
  0x28   :  { %1259 = vmatprep.subr.bf16.mxu0 %v1362_v0  ;;  %1339 = vmatprep.subr.bf16.mxu1 %v1362_v0  ;;  %v1364_v2 = vld [vmem:[#allocation5 + $0x10] sm:$0xff]   ;;  %v1365_v3 = vld [vmem:[#allocation5 + $0x18] sm:$0xff]   ;;  %v41_v4 = vld [vmem:[#allocation2] sm:$0xff]  ;;  %s879_s8 = sshll.u32 %s1576_s1, 4  ;;  %s880_s8 = int_to_ptr.vmem [resolvable:$true] %s879_s8 }
  0x29   :  { %1260 = vmatpush3.bf16.msra.mxu0 %v1362_v0  ;;  %1347 = vmatpush3.bf16.msra.mxu1 %v1362_v0  ;;  %v42_v5 = vld [vmem:[#allocation2 + $0x8] sm:$0xff]  ;;  %v73_v6 = vld [vmem:[#allocation2 + $0x100] sm:$0xff]  ;;  %v1368_v12 = vld [vmem:[#allocation5 + $0x30] sm:$0xff]   ;;  %s1542_s9 = scalar_lea.vmem %s880_s8, 4096  ;;  %p1547_p3 = scmp.lt.s32.totalorder %s880_s8, %s880_s8 }
  0x2a   :  { %1261 = vmatprep.subr.bf16.mxu0 %v1363_v1  ;;  %1340 = vmatprep.subr.bf16.mxu1 %v1363_v1  ;;  %v105_v7 = vpack.c.bf16 %v42_v5, %v41_v4  ;;  %v74_v8 = vld [vmem:[#allocation2 + $0x108] sm:$0xff]  ;;  %v1366_v10 = vld [vmem:[#allocation5 + $0x20] sm:$0xff]   ;;  %v1369_v13 = vld [vmem:[#allocation5 + $0x38] sm:$0xff]   ;;  %p1543_p2 = scmp.ne.s32.totalorder %s880_s8, %s1542_s9  ;;  %p1548_p4 = scmp.lt.s32.totalorder %s1542_s9, %s1542_s9 }
  0x2b   :  { %v121_v9 = vpack.c.bf16 %v74_v8, %v73_v6  ;;  %v1367_v11 = vld [vmem:[#allocation5 + $0x28] sm:$0xff]   ;;  %v43_v14 = vld [vmem:[#allocation2 + $0x10] sm:$0xff]  ;;  %v44_v15 = vld [vmem:[#allocation2 + $0x18] sm:$0xff] }
  0x2c   :  { %1275 = vmatprep.mubr.bf16.mxu0 %v105_v7  ;;  %v75_v16 = vld [vmem:[#allocation2 + $0x110] sm:$0xff]  ;;  %v76_v17 = vld [vmem:[#allocation2 + $0x118] sm:$0xff]  ;;  %v45_v18 = vld [vmem:[#allocation2 + $0x20] sm:$0xff]  ;;  %v106_v22 = vpack.c.bf16 %v44_v15, %v43_v14  ;;  %p1549_p5 = por %p1548_p4, %p1547_p3 }
  0x2d   :  { %1262 = vmatpush3.bf16.msra.mxu0 %v1363_v1  ;;  %1348 = vmatpush3.bf16.msra.mxu1 %v1363_v1  ;;  %v46_v19 = vld [vmem:[#allocation2 + $0x28] sm:$0xff]  ;;  %v77_v20 = vld [vmem:[#allocation2 + $0x120] sm:$0xff]  ;;  %v122_v23 = vpack.c.bf16 %v76_v17, %v75_v16  ;;  %v47_v26 = vld [vmem:[#allocation2 + $0x30] sm:$0xff] }
  0x2e   :  { %1263 = vmatprep.subr.bf16.mxu0 %v1364_v2  ;;  %1341 = vmatprep.subr.bf16.mxu1 %v1364_v2  ;;  %v78_v21 = vld [vmem:[#allocation2 + $0x128] sm:$0xff]  ;;  %v107_v24 = vpack.c.bf16 %v46_v19, %v45_v18  ;;  %v48_v27 = vld [vmem:[#allocation2 + $0x38] sm:$0xff]  ;;  %v79_v28 = vld [vmem:[#allocation2 + $0x130] sm:$0xff]  ;;  %p1550_p6 = pnand %p1549_p5, %p1543_p2 }
  0x2f   :  { %1307 = vmatprep.mubr.bf16.mxu1 %v121_v9  ;;  %v123_v25 = vpack.c.bf16 %v78_v21, %v77_v20  ;;  %v80_v29 = vld [vmem:[#allocation2 + $0x138] sm:$0xff]  ;;  %v49_v30 = vld [vmem:[#allocation2 + $0x40] sm:$0xff]  ;;  %v50_v31 = vld [vmem:[#allocation2 + $0x48] sm:$0xff]  ;;  %v108_v34 = vpack.c.bf16 %v48_v27, %v47_v26 }
  0x30   :  { %v81_v32 = vld [vmem:[#allocation2 + $0x140] sm:$0xff]  ;;  %v82_v33 = vld [vmem:[#allocation2 + $0x148] sm:$0xff]  ;;  %v124_v35 = vpack.c.bf16 %v80_v29, %v79_v28  ;;  %v109_v36 = vpack.c.bf16 %v50_v31, %v49_v30  ;;  %v51_v38 = vld [vmem:[#allocation2 + $0x50] sm:$0xff] }
  0x31   :  { %1264 = vmatpush3.bf16.msra.mxu0 %v1364_v2  ;;  %1349 = vmatpush3.bf16.msra.mxu1 %v1364_v2  ;;  %v125_v37 = vpack.c.bf16 %v82_v33, %v81_v32  ;;  %v52_v39 = vld [vmem:[#allocation2 + $0x58] sm:$0xff]  ;;  %v83_v40 = vld [vmem:[#allocation2 + $0x150] sm:$0xff]  ;;  %v53_v42 = vld [vmem:[#allocation2 + $0x60] sm:$0xff] }
  0x32   :  { %1265 = vmatprep.subr.bf16.mxu0 %v1365_v3  ;;  %1342 = vmatprep.subr.bf16.mxu1 %v1365_v3  ;;  %v84_v41 = vld [vmem:[#allocation2 + $0x158] sm:$0xff]  ;;  %v54_v43 = vld [vmem:[#allocation2 + $0x68] sm:$0xff]  ;;  %v85_v44 = vld [vmem:[#allocation2 + $0x160] sm:$0xff]  ;;  %v110_v46 = vpack.c.bf16 %v52_v39, %v51_v38 }
  0x33   :  { %v86_v45 = vld [vmem:[#allocation2 + $0x168] sm:$0xff]  ;;  %v126_v47 = vpack.c.bf16 %v84_v41, %v83_v40  ;;  %v111_v48 = vpack.c.bf16 %v54_v43, %v53_v42  ;;  %v55_v50 = vld [vmem:[#allocation2 + $0x70] sm:$0xff]  ;;  %v56_v51 = vld [vmem:[#allocation2 + $0x78] sm:$0xff] }
  0x34   :  { %v127_v49 = vpack.c.bf16 %v86_v45, %v85_v44  ;;  %v87_v52 = vld [vmem:[#allocation2 + $0x170] sm:$0xff]  ;;  %v88_v53 = vld [vmem:[#allocation2 + $0x178] sm:$0xff]  ;;  %v57_v54 = vld [vmem:[#allocation2 + $0x80] sm:$0xff]  ;;  %v112_v58 = vpack.c.bf16 %v56_v51, %v55_v50 }
  0x35   :  { %1266 = vmatpush3.bf16.msra.mxu0 %v1365_v3  ;;  %1350 = vmatpush3.bf16.msra.mxu1 %v1365_v3  ;;  %v58_v55 = vld [vmem:[#allocation2 + $0x88] sm:$0xff]  ;;  %v89_v56 = vld [vmem:[#allocation2 + $0x180] sm:$0xff]  ;;  %v128_v59 = vpack.c.bf16 %v88_v53, %v87_v52  ;;  %v59_v62 = vld [vmem:[#allocation2 + $0x90] sm:$0xff] }
  0x36   :  { %1267 = vmatprep.subr.bf16.mxu0 %v1366_v10  ;;  %1343 = vmatprep.subr.bf16.mxu1 %v1366_v10  ;;  %v90_v57 = vld [vmem:[#allocation2 + $0x188] sm:$0xff]  ;;  %v113_v60 = vpack.c.bf16 %v58_v55, %v57_v54  ;;  %v60_v63 = vld [vmem:[#allocation2 + $0x98] sm:$0xff]  ;;  %v91_v0 = vld [vmem:[#allocation2 + $0x190] sm:$0xff] }
  0x37   :  { %v129_v61 = vpack.c.bf16 %v90_v57, %v89_v56  ;;  %v92_v1 = vld [vmem:[#allocation2 + $0x198] sm:$0xff]  ;;  %v61_v2 = vld [vmem:[#allocation2 + $0xa0] sm:$0xff]  ;;  %v62_v3 = vld [vmem:[#allocation2 + $0xa8] sm:$0xff]  ;;  %v114_v6 = vpack.c.bf16 %v60_v63, %v59_v62 }
  0x38   :  { %v93_v4 = vld [vmem:[#allocation2 + $0x1a0] sm:$0xff]  ;;  %v94_v5 = vld [vmem:[#allocation2 + $0x1a8] sm:$0xff]  ;;  %v130_v7 = vpack.c.bf16 %v92_v1, %v91_v0  ;;  %v115_v8 = vpack.c.bf16 %v62_v3, %v61_v2 }
  0x39   :  { %1268 = vmatpush3.bf16.msra.mxu0 %v1366_v10  ;;  %1351 = vmatpush3.bf16.msra.mxu1 %v1366_v10  ;;  %v131_v9 = vpack.c.bf16 %v94_v5, %v93_v4  ;;  %v63_v10 = vld [vmem:[#allocation2 + $0xb0] sm:$0xff]  ;;  %v65_v14 = vld [vmem:[#allocation2 + $0xc0] sm:$0xff]  ;;  %v66_v15 = vld [vmem:[#allocation2 + $0xc8] sm:$0xff] }
  0x3a   :  { %1269 = vmatprep.subr.bf16.mxu0 %v1367_v11  ;;  %1344 = vmatprep.subr.bf16.mxu1 %v1367_v11  ;;  %v97_v16 = vld [vmem:[#allocation2 + $0x1c0] sm:$0xff]  ;;  %v98_v17 = vld [vmem:[#allocation2 + $0x1c8] sm:$0xff]  ;;  %v117_v20 = vpack.c.bf16 %v66_v15, %v65_v14 }
  0x3b   :  { %v133_v21 = vpack.c.bf16 %v98_v17, %v97_v16  ;;  %v69_v26 = vld [vmem:[#allocation2 + $0xe0] sm:$0xff]  ;;  %v70_v27 = vld [vmem:[#allocation2 + $0xe8] sm:$0xff] }
  0x3c   :  { %v101_v28 = vld [vmem:[#allocation2 + $0x1e0] sm:$0xff]  ;;  %v102_v29 = vld [vmem:[#allocation2 + $0x1e8] sm:$0xff]  ;;  %v119_v32 = vpack.c.bf16 %v70_v27, %v69_v26 }
  0x3d   :  { %1270 = vmatpush3.bf16.msra.mxu0 %v1367_v11  ;;  %1352 = vmatpush3.bf16.msra.mxu1 %v1367_v11  ;;  %v64_v11 = vld [vmem:[#allocation2 + $0xb8] sm:$0xff]  ;;  %v135_v33 = vpack.c.bf16 %v102_v29, %v101_v28 }
  0x3e   :  { %1271 = vmatprep.subr.bf16.mxu0 %v1368_v12  ;;  %1345 = vmatprep.subr.bf16.mxu1 %v1368_v12  ;;  %v116_v18 = vpack.c.bf16 %v64_v11, %v63_v10 }
  0x41   :  { %1272 = vmatpush3.bf16.msra.mxu0 %v1368_v12  ;;  %1353 = vmatpush3.bf16.msra.mxu1 %v1368_v12  ;;  %v95_v12 = vld [vmem:[#allocation2 + $0x1b0] sm:$0xff] }
  0x42   :  { %1273 = vmatprep.subr.bf16.mxu0 %v1369_v13  ;;  %1346 = vmatprep.subr.bf16.mxu1 %v1369_v13 }
  0x45   :  { %1274 = vmatpush3.bf16.msra.mxu0 %v1369_v13  ;;  %1354 = vmatpush3.bf16.msra.mxu1 %v1369_v13  ;;  %v96_v13 = vld [vmem:[#allocation2 + $0x1b8] sm:$0xff] }
  0x46   :  { %v132_v19 = vpack.c.bf16 %v96_v13, %v95_v12 }
  0x48   :  { %1276 = vmatmul.mubr.bf16.vlgmr.msra.gmra.mrb[0].mxu0 %v106_v22  ;;  %1308 = vmatmul.mubr.bf16.vlgmr.msra.gmra.mrb[0].mxu1 %v122_v23  ;;  %v67_v22 = vld [vmem:[#allocation2 + $0xd0] sm:$0xff]  ;;  %v68_v23 = vld [vmem:[#allocation2 + $0xd8] sm:$0xff] }
  0x49   :  { %1279 = vmatprep.mubr.bf16.mxu0 %v107_v24  ;;  %1311 = vmatprep.mubr.bf16.mxu1 %v123_v25  ;;  %v99_v24 = vld [vmem:[#allocation2 + $0x1d0] sm:$0xff]  ;;  %v100_v25 = vld [vmem:[#allocation2 + $0x1d8] sm:$0xff]  ;;  %v118_v30 = vpack.c.bf16 %v68_v23, %v67_v22 }
  0x4a   :  { %v134_v31 = vpack.c.bf16 %v100_v25, %v99_v24 }
  0x50   :  { %1280 = vmatmul.mubr.bf16.gmra.mrb[4].mxu0 %v108_v34  ;;  %1312 = vmatmul.mubr.bf16.gmra.mrb[4].mxu1 %v124_v35  ;;  %v71_v34 = vld [vmem:[#allocation2 + $0xf0] sm:$0xff]  ;;  %v72_v35 = vld [vmem:[#allocation2 + $0xf8] sm:$0xff] }
  0x51   :  { %1283 = vmatprep.mubr.bf16.mxu0 %v109_v36  ;;  %1315 = vmatprep.mubr.bf16.mxu1 %v125_v37  ;;  %v103_v36 = vld [vmem:[#allocation2 + $0x1f0] sm:$0xff]  ;;  %v104_v37 = vld [vmem:[#allocation2 + $0x1f8] sm:$0xff]  ;;  %v120_v38 = vpack.c.bf16 %v72_v35, %v71_v34 }
  0x52   :  { %v136_v39 = vpack.c.bf16 %v104_v37, %v103_v36 }
  0x58   :  { %1284 = vmatmul.mubr.bf16.gmra.mrb[8].mxu0 %v110_v46  ;;  %1316 = vmatmul.mubr.bf16.gmra.mrb[8].mxu1 %v126_v47 }
  0x59   :  { %1287 = vmatprep.mubr.bf16.mxu0 %v111_v48  ;;  %1319 = vmatprep.mubr.bf16.mxu1 %v127_v49 }
  0x60   :  { %1288 = vmatmul.mubr.bf16.gmra.mrb[12].mxu0 %v112_v58  ;;  %1320 = vmatmul.mubr.bf16.gmra.mrb[12].mxu1 %v128_v59 }
  0x61   :  { %1291 = vmatprep.mubr.bf16.mxu0 %v113_v60  ;;  %1323 = vmatprep.mubr.bf16.mxu1 %v129_v61 }
  0x68   :  { %1292 = vmatmul.mubr.bf16.gmra.mrb[16].mxu0 %v114_v6  ;;  %1324 = vmatmul.mubr.bf16.gmra.mrb[16].mxu1 %v130_v7 }
  0x69   :  { %1295 = vmatprep.mubr.bf16.mxu0 %v115_v8  ;;  %1327 = vmatprep.mubr.bf16.mxu1 %v131_v9 }
  0x70   :  { %1296 = vmatmul.mubr.bf16.gmra.mrb[20].mxu0 %v116_v18  ;;  %1328 = vmatmul.mubr.bf16.gmra.mrb[20].mxu1 %v132_v19 }
  0x71   :  { %1299 = vmatprep.mubr.bf16.mxu0 %v117_v20  ;;  %1331 = vmatprep.mubr.bf16.mxu1 %v133_v21 }
  0x78   :  { %1300 = vmatmul.mubr.bf16.gmra.mrb[24].mxu0 %v118_v30  ;;  %1332 = vmatmul.mubr.bf16.gmra.mrb[24].mxu1 %v134_v31 }
  0x79   :  { %1303 = vmatprep.mubr.bf16.mxu0 %v119_v32  ;;  %1335 = vmatprep.mubr.bf16.mxu1 %v135_v33 }
  0x80   :  { %1304 = vmatmul.mubr.bf16.gmra.mrb[28].mxu0 %v120_v38  ;;  %1336 = vmatmul.mubr.bf16.gmra.mrb[28].mxu1 %v136_v39 }
 0x11b   :  { %v1277_v40 = vpop.f32.mrb[0].mxu0  ;;  %v1309_v41 = vpop.f32.mrb[0].mxu1 }
 0x11c   :  { %1370 = vtanh.f32 %v1277_v40  ;;  %v235_v42 = vpop.f32.mrb[1].mxu0  ;;  %v363_v43 = vpop.f32.mrb[1].mxu1 }
 0x11d   :  { %1372 = vtanh.f32 %v1309_v41  ;;  %v1278_v44 = vpop.f32.mrb[2].mxu0  ;;  %v1310_v45 = vpop.f32.mrb[2].mxu1 }
 0x11e   :  { %1374 = vtanh.f32 %v235_v42  ;;  %v238_v46 = vpop.f32.mrb[3].mxu0  ;;  %v366_v47 = vpop.f32.mrb[3].mxu1 }
 0x11f   :  { %1376 = vtanh.f32 %v363_v43 }
 0x120   :  { %1378 = vtanh.f32 %v1278_v44 }
 0x121   :  { %1380 = vtanh.f32 %v1310_v45 }
 0x122   :  { %1382 = vtanh.f32 %v238_v46 }
 0x123   :  { %1384 = vtanh.f32 %v366_v47  ;;  %v1281_v48 = vpop.f32.mrb[4].mxu0  ;;  %v1313_v49 = vpop.f32.mrb[4].mxu1 }
 0x124   :  { %1386 = vtanh.f32 %v1281_v48  ;;  %v251_v50 = vpop.f32.mrb[5].mxu0  ;;  %v379_v51 = vpop.f32.mrb[5].mxu1 }
 0x125   :  { %1388 = vtanh.f32 %v1313_v49  ;;  %v1282_v52 = vpop.f32.mrb[6].mxu0  ;;  %v1314_v53 = vpop.f32.mrb[6].mxu1 }
 0x126   :  { %v1371_v54 = vpop.eup %1370  ;;  %1390 = vtanh.f32 %v251_v50  ;;  %v254_v55 = vpop.f32.mrb[7].mxu0 }
 0x127   :  { %v382_v56 = vpop.f32.mrb[7].mxu1  ;;  %v1373_v57 = vpop.eup %1372  ;;  %1392 = vtanh.f32 %v379_v51 }
 0x128   :  { %v1375_v58 = vpop.eup %1374  ;;  %1394 = vtanh.f32 %v1282_v52 }
 0x129   :  { %v1377_v59 = vpop.eup %1376  ;;  %1396 = vtanh.f32 %v1314_v53 }
 0x12a   :  { %v1379_v60 = vpop.eup %1378  ;;  %1398 = vtanh.f32 %v254_v55 }
 0x12b   :  { %v1381_v61 = vpop.eup %1380  ;;  %v1036_v62 = vpack.c.bf16 %v1379_v60, %v1371_v54  ;;  %1400 = vtanh.f32 %v382_v56  ;;  %v1285_v63 = vpop.f32.mrb[8].mxu0 }
 0x12c   :  { %v1317_v0 = vpop.f32.mrb[8].mxu1  ;;  %v1383_v1 = vpop.eup %1382  ;;  %v1116_v2 = vpack.c.bf16 %v1381_v61, %v1373_v57  ;;  %1402 = vtanh.f32 %v1285_v63 }
 0x12d   :  { %v267_v3 = vpop.f32.mrb[9].mxu0  ;;  %v395_v4 = vpop.f32.mrb[9].mxu1  ;;  %1188 = vst [vmem:[#allocation7 + $0x8] sm:$0xff] %v1036_v62   ;;  %v1031_v6 = vpack.c.bf16 %v1383_v1, %v1375_v58  ;;  %1404 = vtanh.f32 %v1317_v0 }
 0x12e   :  { %v1385_v5 = vpop.eup %1384  ;;  %v1286_v7 = vpop.f32.mrb[10].mxu0  ;;  %1204 = vst [vmem:[#allocation7 + $0x88] sm:$0xff] %v1116_v2   ;;  %1406 = vtanh.f32 %v267_v3 }
 0x12f   :  { %v1318_v8 = vpop.f32.mrb[10].mxu1  ;;  %v1387_v9 = vpop.eup %1386  ;;  %v1111_v10 = vpack.c.bf16 %v1385_v5, %v1377_v59  ;;  %1032 = vst [vmem:[#allocation7] sm:$0xff] %v1031_v6   ;;  %1408 = vtanh.f32 %v395_v4 }
 0x130   :  { %v270_v11 = vpop.f32.mrb[11].mxu0  ;;  %v398_v12 = vpop.f32.mrb[11].mxu1  ;;  %1410 = vtanh.f32 %v1286_v7 }
 0x131   :  { %v1389_v13 = vpop.eup %1388  ;;  %1203 = vst [vmem:[#allocation7 + $0x80] sm:$0xff] %v1111_v10   ;;  %1412 = vtanh.f32 %v1318_v8 }
 0x132   :  { %v1391_v14 = vpop.eup %1390  ;;  %1414 = vtanh.f32 %v270_v11 }
 0x133   :  { %v1393_v15 = vpop.eup %1392  ;;  %1416 = vtanh.f32 %v398_v12  ;;  %v1289_v19 = vpop.f32.mrb[12].mxu0 }
 0x134   :  { %v1395_v16 = vpop.eup %1394  ;;  %v1321_v20 = vpop.f32.mrb[12].mxu1  ;;  %1418 = vtanh.f32 %v1289_v19 }
 0x135   :  { %v1397_v17 = vpop.eup %1396  ;;  %v1046_v18 = vpack.c.bf16 %v1395_v16, %v1387_v9  ;;  %v283_v23 = vpop.f32.mrb[13].mxu0  ;;  %1420 = vtanh.f32 %v1321_v20 }
 0x136   :  { %v1399_v21 = vpop.eup %1398  ;;  %v1126_v22 = vpack.c.bf16 %v1397_v17, %v1389_v13  ;;  %v411_v24 = vpop.f32.mrb[13].mxu1  ;;  %1422 = vtanh.f32 %v283_v23 }
 0x137   :  { %v1401_v25 = vpop.eup %1400  ;;  %1190 = vst [vmem:[#allocation7 + $0x18] sm:$0xff] %v1046_v18   ;;  %v1041_v26 = vpack.c.bf16 %v1399_v21, %v1391_v14  ;;  %v1290_v27 = vpop.f32.mrb[14].mxu0  ;;  %1424 = vtanh.f32 %v411_v24 }
 0x138   :  { %v1322_v28 = vpop.f32.mrb[14].mxu1  ;;  %v1403_v29 = vpop.eup %1402  ;;  %1206 = vst [vmem:[#allocation7 + $0x98] sm:$0xff] %v1126_v22   ;;  %v1121_v30 = vpack.c.bf16 %v1401_v25, %v1393_v15  ;;  %1426 = vtanh.f32 %v1290_v27 }
 0x139   :  { %v286_v31 = vpop.f32.mrb[15].mxu0  ;;  %v414_v32 = vpop.f32.mrb[15].mxu1  ;;  %1189 = vst [vmem:[#allocation7 + $0x10] sm:$0xff] %v1041_v26   ;;  %1428 = vtanh.f32 %v1322_v28 }
 0x13a   :  { %v1405_v33 = vpop.eup %1404  ;;  %1205 = vst [vmem:[#allocation7 + $0x90] sm:$0xff] %v1121_v30   ;;  %1430 = vtanh.f32 %v286_v31 }
 0x13b   :  { %v1407_v34 = vpop.eup %1406  ;;  %1432 = vtanh.f32 %v414_v32  ;;  %v1293_v39 = vpop.f32.mrb[16].mxu0 }
 0x13c   :  { %v1409_v35 = vpop.eup %1408  ;;  %v1325_v40 = vpop.f32.mrb[16].mxu1  ;;  %1434 = vtanh.f32 %v1293_v39 }
 0x13d   :  { %v1411_v36 = vpop.eup %1410  ;;  %v299_v43 = vpop.f32.mrb[17].mxu0  ;;  %1436 = vtanh.f32 %v1325_v40 }
 0x13e   :  { %v1413_v37 = vpop.eup %1412  ;;  %v1056_v38 = vpack.c.bf16 %v1411_v36, %v1403_v29  ;;  %v427_v44 = vpop.f32.mrb[17].mxu1  ;;  %1438 = vtanh.f32 %v299_v43 }
 0x13f   :  { %v1415_v41 = vpop.eup %1414  ;;  %v1136_v42 = vpack.c.bf16 %v1413_v37, %v1405_v33  ;;  %v1294_v47 = vpop.f32.mrb[18].mxu0  ;;  %1440 = vtanh.f32 %v427_v44 }
 0x140   :  { %v1417_v45 = vpop.eup %1416  ;;  %1192 = vst [vmem:[#allocation7 + $0x28] sm:$0xff] %v1056_v38   ;;  %v1051_v46 = vpack.c.bf16 %v1415_v41, %v1407_v34  ;;  %v1326_v48 = vpop.f32.mrb[18].mxu1  ;;  %1442 = vtanh.f32 %v1294_v47 }
 0x141   :  { %v1419_v49 = vpop.eup %1418  ;;  %1208 = vst [vmem:[#allocation7 + $0xa8] sm:$0xff] %v1136_v42   ;;  %v1131_v50 = vpack.c.bf16 %v1417_v45, %v1409_v35  ;;  %v302_v51 = vpop.f32.mrb[19].mxu0  ;;  %1444 = vtanh.f32 %v1326_v48 }
 0x142   :  { %v430_v52 = vpop.f32.mrb[19].mxu1  ;;  %v1421_v53 = vpop.eup %1420  ;;  %1191 = vst [vmem:[#allocation7 + $0x20] sm:$0xff] %v1051_v46   ;;  %1446 = vtanh.f32 %v302_v51 }
 0x143   :  { %v1423_v54 = vpop.eup %1422  ;;  %1207 = vst [vmem:[#allocation7 + $0xa0] sm:$0xff] %v1131_v50   ;;  %1448 = vtanh.f32 %v430_v52  ;;  %v1297_v59 = vpop.f32.mrb[20].mxu0 }
 0x144   :  { %v1425_v55 = vpop.eup %1424  ;;  %v1329_v60 = vpop.f32.mrb[20].mxu1  ;;  %1450 = vtanh.f32 %v1297_v59 }
 0x145   :  { %v1427_v56 = vpop.eup %1426  ;;  %v315_v63 = vpop.f32.mrb[21].mxu0  ;;  %1452 = vtanh.f32 %v1329_v60 }
 0x146   :  { %v1429_v57 = vpop.eup %1428  ;;  %v1066_v58 = vpack.c.bf16 %v1427_v56, %v1419_v49  ;;  %v443_v0 = vpop.f32.mrb[21].mxu1  ;;  %1454 = vtanh.f32 %v315_v63 }
 0x147   :  { %v1431_v61 = vpop.eup %1430  ;;  %v1146_v62 = vpack.c.bf16 %v1429_v57, %v1421_v53  ;;  %v1298_v3 = vpop.f32.mrb[22].mxu0  ;;  %1456 = vtanh.f32 %v443_v0 }
 0x148   :  { %v1433_v1 = vpop.eup %1432  ;;  %1194 = vst [vmem:[#allocation7 + $0x38] sm:$0xff] %v1066_v58   ;;  %v1061_v2 = vpack.c.bf16 %v1431_v61, %v1423_v54  ;;  %v1330_v4 = vpop.f32.mrb[22].mxu1  ;;  %1458 = vtanh.f32 %v1298_v3 }
 0x149   :  { %v1435_v5 = vpop.eup %1434  ;;  %1210 = vst [vmem:[#allocation7 + $0xb8] sm:$0xff] %v1146_v62   ;;  %v1141_v6 = vpack.c.bf16 %v1433_v1, %v1425_v55  ;;  %v318_v7 = vpop.f32.mrb[23].mxu0  ;;  %1460 = vtanh.f32 %v1330_v4 }
 0x14a   :  { %v446_v8 = vpop.f32.mrb[23].mxu1  ;;  %v1437_v9 = vpop.eup %1436  ;;  %1193 = vst [vmem:[#allocation7 + $0x30] sm:$0xff] %v1061_v2   ;;  %1462 = vtanh.f32 %v318_v7 }
 0x14b   :  { %v1439_v10 = vpop.eup %1438  ;;  %1209 = vst [vmem:[#allocation7 + $0xb0] sm:$0xff] %v1141_v6   ;;  %1464 = vtanh.f32 %v446_v8  ;;  %v1301_v15 = vpop.f32.mrb[24].mxu0 }
 0x14c   :  { %v1441_v11 = vpop.eup %1440  ;;  %v1333_v16 = vpop.f32.mrb[24].mxu1  ;;  %1466 = vtanh.f32 %v1301_v15 }
 0x14d   :  { %v1443_v12 = vpop.eup %1442  ;;  %v331_v19 = vpop.f32.mrb[25].mxu0  ;;  %1468 = vtanh.f32 %v1333_v16 }
 0x14e   :  { %v1445_v13 = vpop.eup %1444  ;;  %v1076_v14 = vpack.c.bf16 %v1443_v12, %v1435_v5  ;;  %v459_v20 = vpop.f32.mrb[25].mxu1  ;;  %1470 = vtanh.f32 %v331_v19 }
 0x14f   :  { %v1447_v17 = vpop.eup %1446  ;;  %v1156_v18 = vpack.c.bf16 %v1445_v13, %v1437_v9  ;;  %v1302_v23 = vpop.f32.mrb[26].mxu0  ;;  %1472 = vtanh.f32 %v459_v20 }
 0x150   :  { %v1449_v21 = vpop.eup %1448  ;;  %1196 = vst [vmem:[#allocation7 + $0x48] sm:$0xff] %v1076_v14   ;;  %v1071_v22 = vpack.c.bf16 %v1447_v17, %v1439_v10  ;;  %v1334_v24 = vpop.f32.mrb[26].mxu1  ;;  %1474 = vtanh.f32 %v1302_v23 }
 0x151   :  { %v1451_v25 = vpop.eup %1450  ;;  %1212 = vst [vmem:[#allocation7 + $0xc8] sm:$0xff] %v1156_v18   ;;  %v1151_v26 = vpack.c.bf16 %v1449_v21, %v1441_v11  ;;  %v334_v27 = vpop.f32.mrb[27].mxu0  ;;  %1476 = vtanh.f32 %v1334_v24 }
 0x152   :  { %v462_v28 = vpop.f32.mrb[27].mxu1  ;;  %v1453_v29 = vpop.eup %1452  ;;  %1195 = vst [vmem:[#allocation7 + $0x40] sm:$0xff] %v1071_v22   ;;  %1478 = vtanh.f32 %v334_v27 }
 0x153   :  { %v1455_v30 = vpop.eup %1454  ;;  %1211 = vst [vmem:[#allocation7 + $0xc0] sm:$0xff] %v1151_v26   ;;  %1480 = vtanh.f32 %v462_v28  ;;  %v1305_v35 = vpop.f32.mrb[28].mxu0 }
 0x154   :  { %v1457_v31 = vpop.eup %1456  ;;  %v1337_v36 = vpop.f32.mrb[28].mxu1  ;;  %1482 = vtanh.f32 %v1305_v35 }
 0x155   :  { %v1459_v32 = vpop.eup %1458  ;;  %v347_v39 = vpop.f32.mrb[29].mxu0  ;;  %1484 = vtanh.f32 %v1337_v36 }
 0x156   :  { %v1461_v33 = vpop.eup %1460  ;;  %v1086_v34 = vpack.c.bf16 %v1459_v32, %v1451_v25  ;;  %v475_v40 = vpop.f32.mrb[29].mxu1  ;;  %1486 = vtanh.f32 %v347_v39 }
 0x157   :  { %v1463_v37 = vpop.eup %1462  ;;  %v1166_v38 = vpack.c.bf16 %v1461_v33, %v1453_v29  ;;  %v1306_v43 = vpop.f32.mrb[30].mxu0  ;;  %1488 = vtanh.f32 %v475_v40 }
 0x158   :  { %v1465_v41 = vpop.eup %1464  ;;  %1198 = vst [vmem:[#allocation7 + $0x58] sm:$0xff] %v1086_v34   ;;  %v1081_v42 = vpack.c.bf16 %v1463_v37, %v1455_v30  ;;  %v1338_v44 = vpop.f32.mrb[30].mxu1  ;;  %1490 = vtanh.f32 %v1306_v43 }
 0x159   :  { %v1467_v45 = vpop.eup %1466  ;;  %1214 = vst [vmem:[#allocation7 + $0xd8] sm:$0xff] %v1166_v38   ;;  %v1161_v46 = vpack.c.bf16 %v1465_v41, %v1457_v31  ;;  %v350_v47 = vpop.f32.mrb[31].mxu0  ;;  %1492 = vtanh.f32 %v1338_v44 }
 0x15a   :  { %v478_v48 = vpop.f32.mrb[31].mxu1  ;;  %v1469_v49 = vpop.eup %1468  ;;  %1197 = vst [vmem:[#allocation7 + $0x50] sm:$0xff] %v1081_v42   ;;  %1494 = vtanh.f32 %v350_v47 }
 0x15b   :  { %v1471_v50 = vpop.eup %1470  ;;  %1213 = vst [vmem:[#allocation7 + $0xd0] sm:$0xff] %v1161_v46   ;;  %1496 = vtanh.f32 %v478_v48 }
 0x15c   :  { %v1473_v51 = vpop.eup %1472 }
 0x15d   :  { %v1475_v52 = vpop.eup %1474 }
 0x15e   :  { %v1477_v53 = vpop.eup %1476  ;;  %v1096_v54 = vpack.c.bf16 %v1475_v52, %v1467_v45 }
 0x15f   :  { %v1479_v55 = vpop.eup %1478  ;;  %v1176_v56 = vpack.c.bf16 %v1477_v53, %v1469_v49 }
 0x160   :  { %v1481_v57 = vpop.eup %1480  ;;  %1200 = vst [vmem:[#allocation7 + $0x68] sm:$0xff] %v1096_v54   ;;  %v1091_v58 = vpack.c.bf16 %v1479_v55, %v1471_v50 }
 0x161   :  { %v1483_v59 = vpop.eup %1482  ;;  %1216 = vst [vmem:[#allocation7 + $0xe8] sm:$0xff] %v1176_v56   ;;  %v1171_v60 = vpack.c.bf16 %v1481_v57, %v1473_v51 }
 0x162   :  { %v1485_v61 = vpop.eup %1484  ;;  %1199 = vst [vmem:[#allocation7 + $0x60] sm:$0xff] %v1091_v58  }
 0x163   :  { %v1487_v62 = vpop.eup %1486  ;;  %1215 = vst [vmem:[#allocation7 + $0xe0] sm:$0xff] %v1171_v60  }
 0x164   :  { %v1489_v63 = vpop.eup %1488 }
 0x165   :  { %v1491_v0 = vpop.eup %1490 }
 0x166   :  { %v1493_v1 = vpop.eup %1492  ;;  %v1106_v2 = vpack.c.bf16 %v1491_v0, %v1483_v59 }
 0x167   :  { %v1495_v3 = vpop.eup %1494  ;;  %v1186_v4 = vpack.c.bf16 %v1493_v1, %v1485_v61 }
 0x168   :  { %v1497_v5 = vpop.eup %1496  ;;  %1202 = vst [vmem:[#allocation7 + $0x78] sm:$0xff] %v1106_v2   ;;  %v1101_v6 = vpack.c.bf16 %v1495_v3, %v1487_v62 }
 0x169   :  { %1218 = vst [vmem:[#allocation7 + $0xf8] sm:$0xff] %v1186_v4   ;;  %v1181_v7 = vpack.c.bf16 %v1497_v5, %v1489_v63 }
 0x16a   :  { %1201 = vst [vmem:[#allocation7 + $0x70] sm:$0xff] %v1101_v6  }
 0x16b   :  { %1217 = vst [vmem:[#allocation7 + $0xf0] sm:$0xff] %v1181_v7  }
 0x16c   :  { %1553 = shalt.err (!%p1550_p6)
}
 0x16d   :  { %s1554_s12 = scalar_lea.hbm %s1636_s2, 4096 }
 0x16e   :  { %p1555_p7 = scmp.ne.s32.totalorder %s1636_s2, %s1554_s12  ;;  %p1558_p8 = scmp.lt.u32.totalorder %s1554_s12, %s1636_s2 }
 0x170   :  { %p1560_p9 = pnand %p1558_p8, %p1555_p7 }
 0x172   :  { %1563 = shalt.err (!%p1560_p9)
}
 0x173   :  { %885 = dma.vmem_to_hbm [thread:$0]  %s880_s8, 4096, %s1636_s2, [#allocation4], %s1574_s0, %s1574_s0, %s1575_s5  }
 0x174   :  { %1568 = dma.done.wait [#allocation4], 4096  }
 0x175   :  { %1569 = vsyncadd [#allocation4], 4294963200 }
 0x176   :  { %889 = vsyncpa [#allocation3], 1 }
 0x177   :  { %890 = vsyncpa [#allocation6], 1 }
 0x178   :  { %891 = vsyncpa [#allocation4], 1 }

</bundles_post_ra>
